<compile_context>
chip_gen: v5e
topology: v5e:2x2
jax: 0.10.0
libtpu: 0.0.40
codegen_flags: <defaults>
</compile_context>

<pallas_src>
import jax
import jax.numpy as jnp
from jax import lax
from jax.experimental import pallas as pl
from jax.experimental.pallas import tpu as pltpu


# --------------------------------------------------------------------------
# Kernel
# --------------------------------------------------------------------------
def _gru_fc_kernel(
    x_ref,      # (T*BP, I+1)   mxu_dtype, time-major, last column == 1
    h0_ref,     # (BP, H)       f32
    wi_ref,     # (I+1, 3H)     mxu_dtype, cols [r|z|n]; row I = folded biases
    wm_ref,     # (H+1, 3H+O)   mxu_dtype:
                #   [0:H , 0:3H]    = W_h   (cols [r|z|n])
                #   [0:H , 3H:3H+O] = W_fc
                #   [H   , 2H:3H]   = b_hn        [H, 3H:3H+O] = b_fc
    out_ref,    # (BP, H+O) f32 out:  [:, :H] = h_T, [:, H:] = fc(h_T)
):
    TB = x_ref.shape[0]
    BP, H = h0_ref.shape
    H3 = wi_ref.shape[1]
    HO = out_ref.shape[1]
    O = HO - H
    T = TB // BP
    md = wi_ref.dtype

    # ---- Hoisted constants (off the serial chain) --------------------------
    wh = wm_ref[0:H, 0:H3]                                    # (H, 3H)
    wfc = wm_ref[0:H, H3:H3 + O]                              # (H, O)
    b_hn = wm_ref[H:H + 1, 2 * H:3 * H].astype(jnp.float32)   # (1, H)
    b_fc = wm_ref[H:H + 1, H3:H3 + O].astype(jnp.float32)     # (1, O)
    # Hoist the broadcast: JAX does not CSE broadcast_in_dim inside the
    # unrolled loop.
    b_hn_b = jnp.broadcast_to(b_hn, (BP, H))                  # (BP, H) f32

    # ---- Input projections for ALL timesteps: ONE MXU pass -----------------
    # Biases are folded in via the constant-1 column of x / bias row of W_i.
    gates = jnp.dot(x_ref[...], wi_ref[...],
                    preferred_element_type=jnp.float32)       # (T*BP, 3H) f32

    # ---- Serial recurrence: one (BP,H)@(H,3H) MXU push per step -------------
    # T is static -> unroll so adjacent steps' MXU / EUP / VPU work overlaps.
    h = h0_ref[...]                                           # (BP, H) f32
    for t in range(T):
        # Time-major, BP == sublane-group size -> tile-aligned whole-vreg read.
        g = gates[t * BP:(t + 1) * BP, :]                     # (BP, 3H)
        hg = jnp.dot(h.astype(md), wh,
                     preferred_element_type=jnp.float32)      # (BP, 3H)
        # Fused r/z sigmoid: one EUP tanh, no exact divide.
        srz = g[:, 0:2 * H] + hg[:, 0:2 * H]
        rz = 0.5 * (jnp.tanh(0.5 * srz) + 1.0)                # sigmoid(srz)
        r = rz[:, 0:H]
        z = rz[:, H:2 * H]
        n = jnp.tanh(g[:, 2 * H:H3] + r * (hg[:, 2 * H:H3] + b_hn_b))
        h = n + z * (h - n)                                   # == (1-z)*n + z*h

    # ---- Packed output: [h_T | fc(h_T)], one store --------------------------
    y = jnp.dot(h.astype(md), wfc, preferred_element_type=jnp.float32) + b_fc
    out_ref[...] = jnp.concatenate([h, y], axis=-1)


# --------------------------------------------------------------------------
# Parameters (PyTorch nn.GRU / nn.Linear layout) and packing
# --------------------------------------------------------------------------
def init_raw_params(key, input_size, hidden_size, output_size):
    """Synthetic init in the exact PyTorch storage layout."""
    ks = jax.random.split(key, 6)
    bound = 1.0 / jnp.sqrt(hidden_size)

    def u(k, shape):
        return jax.random.uniform(k, shape, jnp.float32, minval=-bound, maxval=bound)

    return {
        "w_ih": u(ks[0], (3 * hidden_size, input_size)),   # [W_ir; W_iz; W_in]
        "w_hh": u(ks[1], (3 * hidden_size, hidden_size)),  # [W_hr; W_hz; W_hn]
        "b_ih": u(ks[2], (3 * hidden_size,)),
        "b_hh": u(ks[3], (3 * hidden_size,)),
        "w_fc": u(ks[4], (output_size, hidden_size)),
        "b_fc": u(ks[5], (output_size,)),
    }


def pack_params(raw, mxu_dtype=jnp.bfloat16):
    """Fuse gate weights and fold every bias into a matmul / packed tile.

    mxu_dtype: jnp.bfloat16 (default; single-pass MXU on v5e/v6e/v7x) or
               jnp.float32 (numerics-check path).  Gate math is f32 either way.
    """
    H3 = raw["w_ih"].shape[0]
    H = H3 // 3
    O = raw["w_fc"].shape[0]
    b_ih, b_hh = raw["b_ih"], raw["b_hh"]

    # W_i augmented with a bias row (pairs with the constant-1 column on x):
    # row I = [b_ir+b_hr | b_iz+b_hz | b_in]  (b_hr/b_hz fold straight into
    # the sigmoid arguments; b_hn cannot fold here, it is multiplied by r).
    bias_row = b_ih.at[0:2 * H].add(b_hh[0:2 * H])                     # (3H,)
    w_i = jnp.concatenate([raw["w_ih"].T, bias_row[None, :]], axis=0)  # (I+1, 3H)

    # One packed constant tile: [[ W_h | W_fc ], [ 0..b_hn | b_fc ]].
    top = jnp.concatenate([raw["w_hh"].T, raw["w_fc"].T], axis=1)      # (H, 3H+O)
    last = jnp.zeros((1, H3 + O), jnp.float32)
    last = last.at[0, 2 * H:3 * H].set(b_hh[2 * H:])                   # b_hn
    last = last.at[0, H3:].set(raw["b_fc"])                            # b_fc
    w_misc = jnp.concatenate([top, last], axis=0)                      # (H+1, 3H+O)

    return {"w_i": w_i.astype(mxu_dtype), "w_misc": w_misc.astype(mxu_dtype)}


# --------------------------------------------------------------------------
# Wrapper
# --------------------------------------------------------------------------
@jax.jit
def _run_pallas(x, h0, params):
    B, T, I = x.shape
    H3 = params["w_i"].shape[1]
    H = H3 // 3
    O = params["w_misc"].shape[1] - H3
    md = params["w_i"].dtype

    # Pad batch to a full sublane group: every per-step read / write in the
    # kernel becomes whole-tile (padded rows are zeros and cost nothing).
    BP = max(8, ((B + 7) // 8) * 8)

    # Wrapper-side layout work (free XLA metadata / tiny one-off ops):
    # time-major transpose, batch pad, constant-1 bias column, flatten, cast.
    x_tm = jnp.transpose(x.astype(jnp.float32), (1, 0, 2))        # (T, B, I)
    x_tm = jnp.pad(x_tm, ((0, 0), (0, BP - B), (0, 0)))           # (T, BP, I)
    ones = jnp.ones((T, BP, 1), jnp.float32)
    x2d = jnp.concatenate([x_tm, ones], axis=-1).reshape(T * BP, I + 1)
    x2d = x2d.astype(md)
    h0p = jnp.pad(h0.astype(jnp.float32), ((0, BP - B), (0, 0)))  # (BP, H)

    vmem = pl.BlockSpec(memory_space=pltpu.MemorySpace.VMEM)
    out = pl.pallas_call(
        _gru_fc_kernel,
        out_shape=jax.ShapeDtypeStruct((BP, H + O), jnp.float32),
        in_specs=[vmem] * 4,
        out_specs=vmem,
    )(x2d, h0p, params["w_i"], params["w_misc"])

    hT = out[:B, :H]
    y = out[:B, H:]
    return y, hT


def feedback_predictor_forward(x, h, _unused, params):
    """Mirrors FeedbackPredictor.forward: returns (fc(out[:, -1, :]), h, None)."""
    B = x.shape[0]
    H = params["w_i"].shape[1] // 3
    if h is None:
        # The PyTorch module hardcodes torch.zeros(1, x.size(0), 16); here we
        # derive H from the params (identical when hidden_size == 16).
        h = jnp.zeros((1, B, H), jnp.float32)
    y, hT = _run_pallas(x.astype(jnp.float32), h[0], params)
    return y, hT[None, :, :], None


# --------------------------------------------------------------------------
# Pure-JAX reference (built directly from the raw PyTorch-layout params)
# --------------------------------------------------------------------------
def _reference_forward(x, h0, raw):
    H = h0.shape[1]
    w_ih, w_hh = raw["w_ih"], raw["w_hh"]
    b_ih, b_hh = raw["b_ih"], raw["b_hh"]

    def cell(h, x_t):
        gi = x_t @ w_ih.T + b_ih
        gh = h @ w_hh.T + b_hh
        r = jax.nn.sigmoid(gi[:, 0:H] + gh[:, 0:H])
        z = jax.nn.sigmoid(gi[:, H:2 * H] + gh[:, H:2 * H])
        n = jnp.tanh(gi[:, 2 * H:] + r * gh[:, 2 * H:])
        return (1.0 - z) * n + z * h, None

    hT, _ = lax.scan(cell, h0, jnp.transpose(x, (1, 0, 2)))
    y = hT @ raw["w_fc"].T + raw["b_fc"]
    return y, hT


# --------------------------------------------------------------------------
if __name__ == "__main__":
    # GRU(input=8, hidden=16) + Linear(16 -> 4), batch=2, seq=8.
    B, T, I, H, O = 2, 8, 8, 16, 4
    key = jax.random.PRNGKey(0)
    k_x, k_p = jax.random.split(key)
    x = jax.random.normal(k_x, (B, T, I), jnp.float32)
    raw = init_raw_params(k_p, I, H, O)

    y_ref, hT_ref = _reference_forward(x, jnp.zeros((B, H), jnp.float32), raw)

    # ---- bf16 MXU operands (default fast path on v5e/v6e/v7x) -------------
    params_bf16 = pack_params(raw, mxu_dtype=jnp.bfloat16)
    y, h_out, extra = feedback_predictor_forward(x, None, None, params_bf16)
    y = jax.block_until_ready(y)
    h_out = jax.block_until_ready(h_out)
    assert y.shape == (B, O) and h_out.shape == (1, B, H) and extra is None
    assert jnp.all(jnp.isfinite(y))
    assert jnp.allclose(y, y_ref, atol=5e-2, rtol=5e-2)
    assert jnp.allclose(h_out[0], hT_ref, atol=5e-2, rtol=5e-2)

    # ---- f32 MXU operands (numerics-check path; default MXU precision) ----
    params_f32 = pack_params(raw, mxu_dtype=jnp.float32)
    y32, h32, _ = feedback_predictor_forward(x, None, None, params_f32)
    y32 = jax.block_until_ready(y32)
    assert jnp.allclose(y32, y_ref, atol=1e-3, rtol=1e-3)
    assert jnp.allclose(h32[0], hT_ref, atol=1e-3, rtol=1e-3)

    print("KERNEL_OK")
</pallas_src>

<mosaic_0001>
module attributes {stable_mosaic.version = 11 : i64} {
  func.func @_gru_fc_kernel(%arg0: memref<64x9xbf16, #tpu.memory_space<vmem>>, %arg1: memref<8x16xf32, #tpu.memory_space<vmem>>, %arg2: memref<9x48xbf16, #tpu.memory_space<vmem>>, %arg3: memref<17x52xbf16, #tpu.memory_space<vmem>>, %arg4: memref<8x20xf32, #tpu.memory_space<vmem>>) attributes {dimension_semantics = [], scalar_prefetch = 0 : i64, scratch_operands = 0 : i64, tpu.core_type = #tpu.core_type<tc>} {
    %c0 = arith.constant 0 : index
    %c0_0 = arith.constant 0 : index
    %0 = vector.load %arg3[%c0, %c0_0] : memref<17x52xbf16, #tpu.memory_space<vmem>>, vector<16x48xbf16>
    %c0_1 = arith.constant 0 : index
    %c48 = arith.constant 48 : index
    %1 = vector.load %arg3[%c0_1, %c48] : memref<17x52xbf16, #tpu.memory_space<vmem>>, vector<16x4xbf16>
    %c16 = arith.constant 16 : index
    %c32 = arith.constant 32 : index
    %2 = vector.load %arg3[%c16, %c32] : memref<17x52xbf16, #tpu.memory_space<vmem>>, vector<1x16xbf16>
    %3 = arith.extf %2 : vector<1x16xbf16> to vector<1x16xf32>
    %c16_2 = arith.constant 16 : index
    %c48_3 = arith.constant 48 : index
    %4 = vector.load %arg3[%c16_2, %c48_3] : memref<17x52xbf16, #tpu.memory_space<vmem>>, vector<1x4xbf16>
    %5 = arith.extf %4 : vector<1x4xbf16> to vector<1x4xf32>
    %6 = vector.shape_cast %3 : vector<1x16xf32> to vector<1x16xf32>
    %7 = vector.broadcast %6 : vector<1x16xf32> to vector<8x16xf32>
    %c0_4 = arith.constant 0 : index
    %c0_5 = arith.constant 0 : index
    %8 = vector.load %arg0[%c0_4, %c0_5] : memref<64x9xbf16, #tpu.memory_space<vmem>>, vector<64x9xbf16>
    %c0_6 = arith.constant 0 : index
    %c0_7 = arith.constant 0 : index
    %9 = vector.load %arg2[%c0_6, %c0_7] : memref<9x48xbf16, #tpu.memory_space<vmem>>, vector<9x48xbf16>
    %cst = arith.constant dense<0.000000e+00> : vector<64x48xf32>
    %10 = tpu.matmul %8, %9, %cst {dimension_numbers = #tpu.dot_dimension_numbers<[1], [0], [0], [1], [0, 0, 1, 1], [], []>} : vector<64x9xbf16>, vector<9x48xbf16>, vector<64x48xf32> -> vector<64x48xf32>
    %c0_8 = arith.constant 0 : index
    %c0_9 = arith.constant 0 : index
    %11 = vector.load %arg1[%c0_8, %c0_9] : memref<8x16xf32, #tpu.memory_space<vmem>>, vector<8x16xf32>
    %12 = vector.extract_strided_slice %10 {offsets = [0, 0], sizes = [8, 48], strides = [1, 1]} : vector<64x48xf32> to vector<8x48xf32>
    %13 = arith.truncf %11 : vector<8x16xf32> to vector<8x16xbf16>
    %cst_10 = arith.constant dense<0.000000e+00> : vector<8x48xf32>
    %14 = tpu.matmul %13, %0, %cst_10 {dimension_numbers = #tpu.dot_dimension_numbers<[1], [0], [0], [1], [0, 0, 1, 1], [], []>} : vector<8x16xbf16>, vector<16x48xbf16>, vector<8x48xf32> -> vector<8x48xf32>
    %15 = vector.extract_strided_slice %12 {offsets = [0, 0], sizes = [8, 32], strides = [1, 1]} : vector<8x48xf32> to vector<8x32xf32>
    %16 = vector.extract_strided_slice %14 {offsets = [0, 0], sizes = [8, 32], strides = [1, 1]} : vector<8x48xf32> to vector<8x32xf32>
    %17 = arith.addf %15, %16 : vector<8x32xf32>
    %cst_11 = arith.constant 5.000000e-01 : f32
    %18 = vector.broadcast %cst_11 : f32 to vector<8x32xf32>
    %19 = arith.mulf %18, %17 : vector<8x32xf32>
    %20 = math.tanh %19 : vector<8x32xf32>
    %cst_12 = arith.constant 1.000000e+00 : f32
    %21 = vector.broadcast %cst_12 : f32 to vector<8x32xf32>
    %22 = arith.addf %20, %21 : vector<8x32xf32>
    %cst_13 = arith.constant 5.000000e-01 : f32
    %23 = vector.broadcast %cst_13 : f32 to vector<8x32xf32>
    %24 = arith.mulf %23, %22 : vector<8x32xf32>
    %25 = vector.extract_strided_slice %24 {offsets = [0, 0], sizes = [8, 16], strides = [1, 1]} : vector<8x32xf32> to vector<8x16xf32>
    %26 = vector.extract_strided_slice %24 {offsets = [0, 16], sizes = [8, 16], strides = [1, 1]} : vector<8x32xf32> to vector<8x16xf32>
    %27 = vector.extract_strided_slice %12 {offsets = [0, 32], sizes = [8, 16], strides = [1, 1]} : vector<8x48xf32> to vector<8x16xf32>
    %28 = vector.extract_strided_slice %14 {offsets = [0, 32], sizes = [8, 16], strides = [1, 1]} : vector<8x48xf32> to vector<8x16xf32>
    %29 = arith.addf %28, %7 : vector<8x16xf32>
    %30 = arith.mulf %25, %29 : vector<8x16xf32>
    %31 = arith.addf %27, %30 : vector<8x16xf32>
    %32 = math.tanh %31 : vector<8x16xf32>
    %33 = arith.subf %11, %32 : vector<8x16xf32>
    %34 = arith.mulf %26, %33 : vector<8x16xf32>
    %35 = arith.addf %32, %34 : vector<8x16xf32>
    %36 = vector.extract_strided_slice %10 {offsets = [8, 0], sizes = [8, 48], strides = [1, 1]} : vector<64x48xf32> to vector<8x48xf32>
    %37 = arith.truncf %35 : vector<8x16xf32> to vector<8x16xbf16>
    %cst_14 = arith.constant dense<0.000000e+00> : vector<8x48xf32>
    %38 = tpu.matmul %37, %0, %cst_14 {dimension_numbers = #tpu.dot_dimension_numbers<[1], [0], [0], [1], [0, 0, 1, 1], [], []>} : vector<8x16xbf16>, vector<16x48xbf16>, vector<8x48xf32> -> vector<8x48xf32>
    %39 = vector.extract_strided_slice %36 {offsets = [0, 0], sizes = [8, 32], strides = [1, 1]} : vector<8x48xf32> to vector<8x32xf32>
    %40 = vector.extract_strided_slice %38 {offsets = [0, 0], sizes = [8, 32], strides = [1, 1]} : vector<8x48xf32> to vector<8x32xf32>
    %41 = arith.addf %39, %40 : vector<8x32xf32>
    %cst_15 = arith.constant 5.000000e-01 : f32
    %42 = vector.broadcast %cst_15 : f32 to vector<8x32xf32>
    %43 = arith.mulf %42, %41 : vector<8x32xf32>
    %44 = math.tanh %43 : vector<8x32xf32>
    %cst_16 = arith.constant 1.000000e+00 : f32
    %45 = vector.broadcast %cst_16 : f32 to vector<8x32xf32>
    %46 = arith.addf %44, %45 : vector<8x32xf32>
    %cst_17 = arith.constant 5.000000e-01 : f32
    %47 = vector.broadcast %cst_17 : f32 to vector<8x32xf32>
    %48 = arith.mulf %47, %46 : vector<8x32xf32>
    %49 = vector.extract_strided_slice %48 {offsets = [0, 0], sizes = [8, 16], strides = [1, 1]} : vector<8x32xf32> to vector<8x16xf32>
    %50 = vector.extract_strided_slice %48 {offsets = [0, 16], sizes = [8, 16], strides = [1, 1]} : vector<8x32xf32> to vector<8x16xf32>
    %51 = vector.extract_strided_slice %36 {offsets = [0, 32], sizes = [8, 16], strides = [1, 1]} : vector<8x48xf32> to vector<8x16xf32>
    %52 = vector.extract_strided_slice %38 {offsets = [0, 32], sizes = [8, 16], strides = [1, 1]} : vector<8x48xf32> to vector<8x16xf32>
    %53 = arith.addf %52, %7 : vector<8x16xf32>
    %54 = arith.mulf %49, %53 : vector<8x16xf32>
    %55 = arith.addf %51, %54 : vector<8x16xf32>
    %56 = math.tanh %55 : vector<8x16xf32>
    %57 = arith.subf %35, %56 : vector<8x16xf32>
    %58 = arith.mulf %50, %57 : vector<8x16xf32>
    %59 = arith.addf %56, %58 : vector<8x16xf32>
    %60 = vector.extract_strided_slice %10 {offsets = [16, 0], sizes = [8, 48], strides = [1, 1]} : vector<64x48xf32> to vector<8x48xf32>
    %61 = arith.truncf %59 : vector<8x16xf32> to vector<8x16xbf16>
    %cst_18 = arith.constant dense<0.000000e+00> : vector<8x48xf32>
    %62 = tpu.matmul %61, %0, %cst_18 {dimension_numbers = #tpu.dot_dimension_numbers<[1], [0], [0], [1], [0, 0, 1, 1], [], []>} : vector<8x16xbf16>, vector<16x48xbf16>, vector<8x48xf32> -> vector<8x48xf32>
    %63 = vector.extract_strided_slice %60 {offsets = [0, 0], sizes = [8, 32], strides = [1, 1]} : vector<8x48xf32> to vector<8x32xf32>
    %64 = vector.extract_strided_slice %62 {offsets = [0, 0], sizes = [8, 32], strides = [1, 1]} : vector<8x48xf32> to vector<8x32xf32>
    %65 = arith.addf %63, %64 : vector<8x32xf32>
    %cst_19 = arith.constant 5.000000e-01 : f32
    %66 = vector.broadcast %cst_19 : f32 to vector<8x32xf32>
    %67 = arith.mulf %66, %65 : vector<8x32xf32>
    %68 = math.tanh %67 : vector<8x32xf32>
    %cst_20 = arith.constant 1.000000e+00 : f32
    %69 = vector.broadcast %cst_20 : f32 to vector<8x32xf32>
    %70 = arith.addf %68, %69 : vector<8x32xf32>
    %cst_21 = arith.constant 5.000000e-01 : f32
    %71 = vector.broadcast %cst_21 : f32 to vector<8x32xf32>
    %72 = arith.mulf %71, %70 : vector<8x32xf32>
    %73 = vector.extract_strided_slice %72 {offsets = [0, 0], sizes = [8, 16], strides = [1, 1]} : vector<8x32xf32> to vector<8x16xf32>
    %74 = vector.extract_strided_slice %72 {offsets = [0, 16], sizes = [8, 16], strides = [1, 1]} : vector<8x32xf32> to vector<8x16xf32>
    %75 = vector.extract_strided_slice %60 {offsets = [0, 32], sizes = [8, 16], strides = [1, 1]} : vector<8x48xf32> to vector<8x16xf32>
    %76 = vector.extract_strided_slice %62 {offsets = [0, 32], sizes = [8, 16], strides = [1, 1]} : vector<8x48xf32> to vector<8x16xf32>
    %77 = arith.addf %76, %7 : vector<8x16xf32>
    %78 = arith.mulf %73, %77 : vector<8x16xf32>
    %79 = arith.addf %75, %78 : vector<8x16xf32>
    %80 = math.tanh %79 : vector<8x16xf32>
    %81 = arith.subf %59, %80 : vector<8x16xf32>
    %82 = arith.mulf %74, %81 : vector<8x16xf32>
    %83 = arith.addf %80, %82 : vector<8x16xf32>
    %84 = vector.extract_strided_slice %10 {offsets = [24, 0], sizes = [8, 48], strides = [1, 1]} : vector<64x48xf32> to vector<8x48xf32>
    %85 = arith.truncf %83 : vector<8x16xf32> to vector<8x16xbf16>
    %cst_22 = arith.constant dense<0.000000e+00> : vector<8x48xf32>
    %86 = tpu.matmul %85, %0, %cst_22 {dimension_numbers = #tpu.dot_dimension_numbers<[1], [0], [0], [1], [0, 0, 1, 1], [], []>} : vector<8x16xbf16>, vector<16x48xbf16>, vector<8x48xf32> -> vector<8x48xf32>
    %87 = vector.extract_strided_slice %84 {offsets = [0, 0], sizes = [8, 32], strides = [1, 1]} : vector<8x48xf32> to vector<8x32xf32>
    %88 = vector.extract_strided_slice %86 {offsets = [0, 0], sizes = [8, 32], strides = [1, 1]} : vector<8x48xf32> to vector<8x32xf32>
    %89 = arith.addf %87, %88 : vector<8x32xf32>
    %cst_23 = arith.constant 5.000000e-01 : f32
    %90 = vector.broadcast %cst_23 : f32 to vector<8x32xf32>
    %91 = arith.mulf %90, %89 : vector<8x32xf32>
    %92 = math.tanh %91 : vector<8x32xf32>
    %cst_24 = arith.constant 1.000000e+00 : f32
    %93 = vector.broadcast %cst_24 : f32 to vector<8x32xf32>
    %94 = arith.addf %92, %93 : vector<8x32xf32>
    %cst_25 = arith.constant 5.000000e-01 : f32
    %95 = vector.broadcast %cst_25 : f32 to vector<8x32xf32>
    %96 = arith.mulf %95, %94 : vector<8x32xf32>
    %97 = vector.extract_strided_slice %96 {offsets = [0, 0], sizes = [8, 16], strides = [1, 1]} : vector<8x32xf32> to vector<8x16xf32>
    %98 = vector.extract_strided_slice %96 {offsets = [0, 16], sizes = [8, 16], strides = [1, 1]} : vector<8x32xf32> to vector<8x16xf32>
    %99 = vector.extract_strided_slice %84 {offsets = [0, 32], sizes = [8, 16], strides = [1, 1]} : vector<8x48xf32> to vector<8x16xf32>
    %100 = vector.extract_strided_slice %86 {offsets = [0, 32], sizes = [8, 16], strides = [1, 1]} : vector<8x48xf32> to vector<8x16xf32>
    %101 = arith.addf %100, %7 : vector<8x16xf32>
    %102 = arith.mulf %97, %101 : vector<8x16xf32>
    %103 = arith.addf %99, %102 : vector<8x16xf32>
    %104 = math.tanh %103 : vector<8x16xf32>
    %105 = arith.subf %83, %104 : vector<8x16xf32>
    %106 = arith.mulf %98, %105 : vector<8x16xf32>
    %107 = arith.addf %104, %106 : vector<8x16xf32>
    %108 = vector.extract_strided_slice %10 {offsets = [32, 0], sizes = [8, 48], strides = [1, 1]} : vector<64x48xf32> to vector<8x48xf32>
    %109 = arith.truncf %107 : vector<8x16xf32> to vector<8x16xbf16>
    %cst_26 = arith.constant dense<0.000000e+00> : vector<8x48xf32>
    %110 = tpu.matmul %109, %0, %cst_26 {dimension_numbers = #tpu.dot_dimension_numbers<[1], [0], [0], [1], [0, 0, 1, 1], [], []>} : vector<8x16xbf16>, vector<16x48xbf16>, vector<8x48xf32> -> vector<8x48xf32>
    %111 = vector.extract_strided_slice %108 {offsets = [0, 0], sizes = [8, 32], strides = [1, 1]} : vector<8x48xf32> to vector<8x32xf32>
    %112 = vector.extract_strided_slice %110 {offsets = [0, 0], sizes = [8, 32], strides = [1, 1]} : vector<8x48xf32> to vector<8x32xf32>
    %113 = arith.addf %111, %112 : vector<8x32xf32>
    %cst_27 = arith.constant 5.000000e-01 : f32
    %114 = vector.broadcast %cst_27 : f32 to vector<8x32xf32>
    %115 = arith.mulf %114, %113 : vector<8x32xf32>
    %116 = math.tanh %115 : vector<8x32xf32>
    %cst_28 = arith.constant 1.000000e+00 : f32
    %117 = vector.broadcast %cst_28 : f32 to vector<8x32xf32>
    %118 = arith.addf %116, %117 : vector<8x32xf32>
    %cst_29 = arith.constant 5.000000e-01 : f32
    %119 = vector.broadcast %cst_29 : f32 to vector<8x32xf32>
    %120 = arith.mulf %119, %118 : vector<8x32xf32>
    %121 = vector.extract_strided_slice %120 {offsets = [0, 0], sizes = [8, 16], strides = [1, 1]} : vector<8x32xf32> to vector<8x16xf32>
    %122 = vector.extract_strided_slice %120 {offsets = [0, 16], sizes = [8, 16], strides = [1, 1]} : vector<8x32xf32> to vector<8x16xf32>
    %123 = vector.extract_strided_slice %108 {offsets = [0, 32], sizes = [8, 16], strides = [1, 1]} : vector<8x48xf32> to vector<8x16xf32>
    %124 = vector.extract_strided_slice %110 {offsets = [0, 32], sizes = [8, 16], strides = [1, 1]} : vector<8x48xf32> to vector<8x16xf32>
    %125 = arith.addf %124, %7 : vector<8x16xf32>
    %126 = arith.mulf %121, %125 : vector<8x16xf32>
    %127 = arith.addf %123, %126 : vector<8x16xf32>
    %128 = math.tanh %127 : vector<8x16xf32>
    %129 = arith.subf %107, %128 : vector<8x16xf32>
    %130 = arith.mulf %122, %129 : vector<8x16xf32>
    %131 = arith.addf %128, %130 : vector<8x16xf32>
    %132 = vector.extract_strided_slice %10 {offsets = [40, 0], sizes = [8, 48], strides = [1, 1]} : vector<64x48xf32> to vector<8x48xf32>
    %133 = arith.truncf %131 : vector<8x16xf32> to vector<8x16xbf16>
    %cst_30 = arith.constant dense<0.000000e+00> : vector<8x48xf32>
    %134 = tpu.matmul %133, %0, %cst_30 {dimension_numbers = #tpu.dot_dimension_numbers<[1], [0], [0], [1], [0, 0, 1, 1], [], []>} : vector<8x16xbf16>, vector<16x48xbf16>, vector<8x48xf32> -> vector<8x48xf32>
    %135 = vector.extract_strided_slice %132 {offsets = [0, 0], sizes = [8, 32], strides = [1, 1]} : vector<8x48xf32> to vector<8x32xf32>
    %136 = vector.extract_strided_slice %134 {offsets = [0, 0], sizes = [8, 32], strides = [1, 1]} : vector<8x48xf32> to vector<8x32xf32>
    %137 = arith.addf %135, %136 : vector<8x32xf32>
    %cst_31 = arith.constant 5.000000e-01 : f32
    %138 = vector.broadcast %cst_31 : f32 to vector<8x32xf32>
    %139 = arith.mulf %138, %137 : vector<8x32xf32>
    %140 = math.tanh %139 : vector<8x32xf32>
    %cst_32 = arith.constant 1.000000e+00 : f32
    %141 = vector.broadcast %cst_32 : f32 to vector<8x32xf32>
    %142 = arith.addf %140, %141 : vector<8x32xf32>
    %cst_33 = arith.constant 5.000000e-01 : f32
    %143 = vector.broadcast %cst_33 : f32 to vector<8x32xf32>
    %144 = arith.mulf %143, %142 : vector<8x32xf32>
    %145 = vector.extract_strided_slice %144 {offsets = [0, 0], sizes = [8, 16], strides = [1, 1]} : vector<8x32xf32> to vector<8x16xf32>
    %146 = vector.extract_strided_slice %144 {offsets = [0, 16], sizes = [8, 16], strides = [1, 1]} : vector<8x32xf32> to vector<8x16xf32>
    %147 = vector.extract_strided_slice %132 {offsets = [0, 32], sizes = [8, 16], strides = [1, 1]} : vector<8x48xf32> to vector<8x16xf32>
    %148 = vector.extract_strided_slice %134 {offsets = [0, 32], sizes = [8, 16], strides = [1, 1]} : vector<8x48xf32> to vector<8x16xf32>
    %149 = arith.addf %148, %7 : vector<8x16xf32>
    %150 = arith.mulf %145, %149 : vector<8x16xf32>
    %151 = arith.addf %147, %150 : vector<8x16xf32>
    %152 = math.tanh %151 : vector<8x16xf32>
    %153 = arith.subf %131, %152 : vector<8x16xf32>
    %154 = arith.mulf %146, %153 : vector<8x16xf32>
    %155 = arith.addf %152, %154 : vector<8x16xf32>
    %156 = vector.extract_strided_slice %10 {offsets = [48, 0], sizes = [8, 48], strides = [1, 1]} : vector<64x48xf32> to vector<8x48xf32>
    %157 = arith.truncf %155 : vector<8x16xf32> to vector<8x16xbf16>
    %cst_34 = arith.constant dense<0.000000e+00> : vector<8x48xf32>
    %158 = tpu.matmul %157, %0, %cst_34 {dimension_numbers = #tpu.dot_dimension_numbers<[1], [0], [0], [1], [0, 0, 1, 1], [], []>} : vector<8x16xbf16>, vector<16x48xbf16>, vector<8x48xf32> -> vector<8x48xf32>
    %159 = vector.extract_strided_slice %156 {offsets = [0, 0], sizes = [8, 32], strides = [1, 1]} : vector<8x48xf32> to vector<8x32xf32>
    %160 = vector.extract_strided_slice %158 {offsets = [0, 0], sizes = [8, 32], strides = [1, 1]} : vector<8x48xf32> to vector<8x32xf32>
    %161 = arith.addf %159, %160 : vector<8x32xf32>
    %cst_35 = arith.constant 5.000000e-01 : f32
    %162 = vector.broadcast %cst_35 : f32 to vector<8x32xf32>
    %163 = arith.mulf %162, %161 : vector<8x32xf32>
    %164 = math.tanh %163 : vector<8x32xf32>
    %cst_36 = arith.constant 1.000000e+00 : f32
    %165 = vector.broadcast %cst_36 : f32 to vector<8x32xf32>
    %166 = arith.addf %164, %165 : vector<8x32xf32>
    %cst_37 = arith.constant 5.000000e-01 : f32
    %167 = vector.broadcast %cst_37 : f32 to vector<8x32xf32>
    %168 = arith.mulf %167, %166 : vector<8x32xf32>
    %169 = vector.extract_strided_slice %168 {offsets = [0, 0], sizes = [8, 16], strides = [1, 1]} : vector<8x32xf32> to vector<8x16xf32>
    %170 = vector.extract_strided_slice %168 {offsets = [0, 16], sizes = [8, 16], strides = [1, 1]} : vector<8x32xf32> to vector<8x16xf32>
    %171 = vector.extract_strided_slice %156 {offsets = [0, 32], sizes = [8, 16], strides = [1, 1]} : vector<8x48xf32> to vector<8x16xf32>
    %172 = vector.extract_strided_slice %158 {offsets = [0, 32], sizes = [8, 16], strides = [1, 1]} : vector<8x48xf32> to vector<8x16xf32>
    %173 = arith.addf %172, %7 : vector<8x16xf32>
    %174 = arith.mulf %169, %173 : vector<8x16xf32>
    %175 = arith.addf %171, %174 : vector<8x16xf32>
    %176 = math.tanh %175 : vector<8x16xf32>
    %177 = arith.subf %155, %176 : vector<8x16xf32>
    %178 = arith.mulf %170, %177 : vector<8x16xf32>
    %179 = arith.addf %176, %178 : vector<8x16xf32>
    %180 = vector.extract_strided_slice %10 {offsets = [56, 0], sizes = [8, 48], strides = [1, 1]} : vector<64x48xf32> to vector<8x48xf32>
    %181 = arith.truncf %179 : vector<8x16xf32> to vector<8x16xbf16>
    %cst_38 = arith.constant dense<0.000000e+00> : vector<8x48xf32>
    %182 = tpu.matmul %181, %0, %cst_38 {dimension_numbers = #tpu.dot_dimension_numbers<[1], [0], [0], [1], [0, 0, 1, 1], [], []>} : vector<8x16xbf16>, vector<16x48xbf16>, vector<8x48xf32> -> vector<8x48xf32>
    %183 = vector.extract_strided_slice %180 {offsets = [0, 0], sizes = [8, 32], strides = [1, 1]} : vector<8x48xf32> to vector<8x32xf32>
    %184 = vector.extract_strided_slice %182 {offsets = [0, 0], sizes = [8, 32], strides = [1, 1]} : vector<8x48xf32> to vector<8x32xf32>
    %185 = arith.addf %183, %184 : vector<8x32xf32>
    %cst_39 = arith.constant 5.000000e-01 : f32
    %186 = vector.broadcast %cst_39 : f32 to vector<8x32xf32>
    %187 = arith.mulf %186, %185 : vector<8x32xf32>
    %188 = math.tanh %187 : vector<8x32xf32>
    %cst_40 = arith.constant 1.000000e+00 : f32
    %189 = vector.broadcast %cst_40 : f32 to vector<8x32xf32>
    %190 = arith.addf %188, %189 : vector<8x32xf32>
    %cst_41 = arith.constant 5.000000e-01 : f32
    %191 = vector.broadcast %cst_41 : f32 to vector<8x32xf32>
    %192 = arith.mulf %191, %190 : vector<8x32xf32>
    %193 = vector.extract_strided_slice %192 {offsets = [0, 0], sizes = [8, 16], strides = [1, 1]} : vector<8x32xf32> to vector<8x16xf32>
    %194 = vector.extract_strided_slice %192 {offsets = [0, 16], sizes = [8, 16], strides = [1, 1]} : vector<8x32xf32> to vector<8x16xf32>
    %195 = vector.extract_strided_slice %180 {offsets = [0, 32], sizes = [8, 16], strides = [1, 1]} : vector<8x48xf32> to vector<8x16xf32>
    %196 = vector.extract_strided_slice %182 {offsets = [0, 32], sizes = [8, 16], strides = [1, 1]} : vector<8x48xf32> to vector<8x16xf32>
    %197 = arith.addf %196, %7 : vector<8x16xf32>
    %198 = arith.mulf %193, %197 : vector<8x16xf32>
    %199 = arith.addf %195, %198 : vector<8x16xf32>
    %200 = math.tanh %199 : vector<8x16xf32>
    %201 = arith.subf %179, %200 : vector<8x16xf32>
    %202 = arith.mulf %194, %201 : vector<8x16xf32>
    %203 = arith.addf %200, %202 : vector<8x16xf32>
    %204 = arith.truncf %203 : vector<8x16xf32> to vector<8x16xbf16>
    %cst_42 = arith.constant dense<0.000000e+00> : vector<8x4xf32>
    %205 = tpu.matmul %204, %1, %cst_42 {dimension_numbers = #tpu.dot_dimension_numbers<[1], [0], [0], [1], [0, 0, 1, 1], [], []>} : vector<8x16xbf16>, vector<16x4xbf16>, vector<8x4xf32> -> vector<8x4xf32>
    %206 = vector.broadcast %5 : vector<1x4xf32> to vector<8x4xf32>
    %207 = arith.addf %205, %206 : vector<8x4xf32>
    %208 = tpu.concatenate %203, %207 in 1 : vector<8x16xf32>, vector<8x4xf32> -> vector<8x20xf32>
    %c0_43 = arith.constant 0 : index
    %c0_44 = arith.constant 0 : index
    %209 = vector.load %arg4[%c0_43, %c0_44] : memref<8x20xf32, #tpu.memory_space<vmem>>, vector<8x20xf32>
    tpu.vector_store %arg4[%c0_43, %c0_44], %208 {strides = array<i32>} : memref<8x20xf32, #tpu.memory_space<vmem>>, vector<8x20xf32>,
    return
  }
}

</mosaic_0001>

<bundles_post_ra>
// kernel: _run_pallas.1
= control target key start
LH: loop header
LB: loop body
LE: loop exit
PB: predicated region body
PF: predicated region fallthrough
CT: control target
= control target key end

     0   :  { %vm71_vm0 = vcmask 1043456   ;;  %vm72_vm1 = vcmask 1044480   ;;  %v623_v3 = vmov 65535   ;;  %vm115_vm2 = vcmask 130048   ;;  %s624_s25 = smov 96   ;;  %s626_s26 = smov 16   ;;  %s763_s3 = inlined_call_operand.vmem [shape: bf16[17,52], index: 3, kind: input, shape index: {}]   ;;  %s764_s2 = inlined_call_operand.vmem [shape: bf16[9,48], index: 2, kind: input, shape index: {}]   ;;  %s765_s1 = inlined_call_operand.vmem [shape: f32[8,16], index: 1, kind: input, shape index: {}]   ;;  %s766_s0 = inlined_call_operand.vmem [shape: bf16[64,9], index: 0, kind: input, shape index: {}]   ;;  %s767_s4 = inlined_call_operand.vmem [shape: f32[8,20], index: 4, kind: output, shape index: {}]  }
   0x1   :  { %v657_v0 = vld [vmem:[%s763_s3] sm:$0xff]  ;;  %v73_v4 = vsel %vm71_vm0, 4294967295, %v623_v3  ;;  %vm58_vm3 = vcmask 72704   ;;  %v20_v11 = vld [vmem:[%s763_s3 + $0x8] sm:$0x1]  ;;  %s625_s3 = smov 32  }
   0x2   :  { %v560_v1 = vld [vmem:[%s764_s2] sm:$0xf]  ;;  %v584_v2 = vld [vmem:[%s764_s2] sm:$0x10]  ;;  %v74_v6 = vsel %vm72_vm1, %v73_v4, 0  ;;  %126 = vmatpush.bf16.msra.mxu1 %v657_v0  ;;  %178 = vmatpush.bf16.msra.mxu2 %v657_v0  ;;  %v21_v12 = vunpack.c.l.bf16 %v20_v11  ;;  %s627_s27 = smov 112  }
   0x3   :  { %v561_v5 = vor.u32 %v584_v2, %v560_v1  ;;  %v107_v7 = vld [vmem:[%s765_s1] sm:$0xff]  ;;  %226 = vmatpush.bf16.msra.mxu3 %v657_v0  ;;  %v581_v56 = vld [vmem:[%s766_s0 + $0x8] sm:$0xff]  ;;  %vm536_vm4 = vcmask 162816  }
   0x4   :  { %v108_v8 = vpack.c.bf16 %v107_v7, %v107_v7  ;;  %v580_v10 = vld [vmem:[%s766_s0] sm:$0xff]  ;;  %v683_v13 = vperm.slane %v21_v12, 0 }
   0x5   :  { %v76_v9 = vand.u32 %v561_v5, %v74_v6 }
   0x6   :  { %274 = vmatpush.bf16.msrb.mxu1 %v657_v0  ;;  %322 = vmatpush.bf16.msrb.mxu2 %v657_v0 }
   0x7   :  { %370 = vmatpush.bf16.msrb.mxu3 %v657_v0  ;;  %85 = vmatpush.bf16.msra.mxu0 %v76_v9 }
   0x8   :  { %570 = vmatmul.msk.bf16.vlgmr.msra.gmra.mxu1 %vm115_vm2, %v108_v8 }
   0xa   :  { %418 = vmatpush.bf16.msra.mxu1 %v657_v0  ;;  %562 = vmatmul.msk.bf16.vlgmr.msra.gmra.mxu0 %vm58_vm3, %v580_v10 }
  0x1a   :  { %563 = vmatmul.msk.bf16.gmra.mxu0 %vm58_vm3, %v581_v56 }
  0x85   :  { %v128_v14 = vpop.f32.mrf.mxu1 }
  0x86   :  { %v137_v15 = vadd.f32 %v128_v14, %v683_v13 }
  0x87   :  { %v87_v17 = vpop.f32.mrf.mxu0 }
  0x88   :  { %139 = vrot.lane.b32.xlu0 %v137_v15, %s624_s25  ;;  %v132_v18 = vadd.f32 %v128_v14, %v87_v17 }
  0x8a   :  { %v133_v19 = vmul.f32 0.5, %v132_v18 }
  0x8c   :  { %591 = vtanh.f32 %v133_v19 }
  0x8d   :  { %v130_v16 = vpop.f32.mrf.mxu1 }
  0x8f   :  { %v89_v39 = vpop.f32.mrf.mxu0 }
  0x92   :  { %v592_v20 = vpop.eup %591 }
  0x93   :  { %v135_v21 = vadd.f32 1.0, %v592_v20 }
  0x95   :  { %v136_v22 = vmul.f32 0.5, %v135_v21 }
  0x97   :  { %v92_v61 = vpop.f32.mrf.mxu0 }
  0x9f   :  { %v94_v20 = vpop.f32.mrf.mxu0 }
  0xfa   :  { %v140_v23 = vpop.permute.xlu0 %139 }
  0xfb   :  { %v142_v24 = vmul.f32 %v140_v23, %v136_v22 }
  0xfd   :  { %144 = vrot.lane.b32.xlu0 %v142_v24, %s625_s3 }
 0x16f   :  { %v145_v25 = vpop.permute.xlu0 %144 }
 0x170   :  { %v147_v26 = vadd.f32 %v145_v25, %v87_v17 }
 0x172   :  { %593 = vtanh.f32 %v147_v26 }
 0x178   :  { %v594_v27 = vpop.eup %593 }
 0x179   :  { %150 = vrot.lane.b32.xlu1 %v594_v27, %s624_s25 }
 0x1eb   :  { %v151_v28 = vpop.permute.xlu1 %150 }
 0x1ec   :  { %v153_v29 = vsub.f32 %v107_v7, %v151_v28 }
 0x1ee   :  { %155 = vrot.lane.b32.xlu1 %v153_v29, %s626_s26 }
 0x260   :  { %v156_v30 = vpop.permute.xlu1 %155 }
 0x261   :  { %v158_v31 = vmul.f32 %v156_v30, %v136_v22 }
 0x263   :  { %160 = vrot.lane.b32.xlu2 %v158_v31, %s626_s26 }
 0x2bd   :  { %v161_v32 = vpop.permute.xlu2 %160 }
 0x2be   :  { %v163_v33 = vadd.f32 %v594_v27, %v161_v32 }
 0x2c0   :  { %v164_v34 = vpack.c.bf16 %v163_v33, %v163_v33 }
 0x2c2   :  { %166 = vrot.lane.b32.xlu2 %v164_v34, %s624_s25 }
 0x31c   :  { %v167_v35 = vpop.permute.xlu2 %166 }
 0x31d   :  { %571 = vmatmul.msk.bf16.vlgmr.msra.gmra.mxu2 %vm115_vm2, %v167_v35 }
 0x31e   :  { %466 = vmatpush.bf16.msra.mxu2 %v657_v0 }
 0x3a0   :  { %v180_v36 = vpop.f32.mrf.mxu2 }
 0x3a1   :  { %v189_v37 = vadd.f32 %v180_v36, %v683_v13  ;;  %v184_v40 = vadd.f32 %v180_v36, %v89_v39 }
 0x3a3   :  { %191 = vrot.lane.b32.xlu0 %v189_v37, %s624_s25  ;;  %v185_v41 = vmul.f32 0.5, %v184_v40  ;;  %v582_v37 = vld [vmem:[%s766_s0 + $0x10] sm:$0xff] }
 0x3a4   :  { %564 = vmatmul.msk.bf16.gmra.mxu0 %vm58_vm3, %v582_v37 }
 0x3a5   :  { %595 = vtanh.f32 %v185_v41 }
 0x3a8   :  { %v182_v38 = vpop.f32.mrf.mxu2 }
 0x3ab   :  { %v596_v42 = vpop.eup %595 }
 0x3ac   :  { %v187_v43 = vadd.f32 1.0, %v596_v42 }
 0x3ae   :  { %v188_v44 = vmul.f32 0.5, %v187_v43 }
 0x415   :  { %v192_v45 = vpop.permute.xlu0 %191 }
 0x416   :  { %v194_v46 = vmul.f32 %v192_v45, %v188_v44 }
 0x418   :  { %196 = vrot.lane.b32.xlu1 %v194_v46, %s625_s3 }
 0x421   :  { %v97_v42 = vpop.f32.mrf.mxu0 }
 0x48a   :  { %v197_v47 = vpop.permute.xlu1 %196 }
 0x48b   :  { %v199_v48 = vadd.f32 %v197_v47, %v89_v39 }
 0x48d   :  { %597 = vtanh.f32 %v199_v48 }
 0x493   :  { %v598_v49 = vpop.eup %597 }
 0x494   :  { %v201_v50 = vsub.f32 %v163_v33, %v598_v49 }
 0x496   :  { %203 = vrot.lane.b32.xlu2 %v201_v50, %s627_s27 }
 0x4f0   :  { %v204_v51 = vpop.permute.xlu2 %203 }
 0x4f1   :  { %v206_v52 = vmul.f32 %v204_v51, %v188_v44 }
 0x4f3   :  { %208 = vrot.lane.b32.xlu0 %v206_v52, %s626_s26 }
 0x565   :  { %v209_v53 = vpop.permute.xlu0 %208 }
 0x566   :  { %v211_v54 = vadd.f32 %v598_v49, %v209_v53 }
 0x568   :  { %v212_v55 = vpack.c.bf16 %v211_v54, %v211_v54 }
 0x56a   :  { %214 = vrot.lane.b32.xlu1 %v212_v55, %s624_s25 }
 0x5dc   :  { %v215_v57 = vpop.permute.xlu1 %214 }
 0x5dd   :  { %572 = vmatmul.msk.bf16.vlgmr.msra.gmra.mxu3 %vm115_vm2, %v215_v57 }
 0x660   :  { %v228_v58 = vpop.f32.mrf.mxu3 }
 0x661   :  { %v237_v59 = vadd.f32 %v228_v58, %v683_v13  ;;  %v232_v62 = vadd.f32 %v228_v58, %v92_v61 }
 0x663   :  { %239 = vrot.lane.b32.xlu2 %v237_v59, %s624_s25  ;;  %v233_v63 = vmul.f32 0.5, %v232_v62 }
 0x665   :  { %599 = vtanh.f32 %v233_v63  ;;  %v99_v63 = vpop.f32.mrf.mxu0 }
 0x668   :  { %v230_v60 = vpop.f32.mrf.mxu3 }
 0x66b   :  { %v600_v1 = vpop.eup %599 }
 0x66c   :  { %v235_v2 = vadd.f32 1.0, %v600_v1 }
 0x66e   :  { %v236_v3 = vmul.f32 0.5, %v235_v2 }
 0x6bd   :  { %v240_v4 = vpop.permute.xlu2 %239 }
 0x6be   :  { %v242_v5 = vmul.f32 %v240_v4, %v236_v3 }
 0x6c0   :  { %244 = vrot.lane.b32.xlu0 %v242_v5, %s625_s3 }
 0x732   :  { %v245_v6 = vpop.permute.xlu0 %244 }
 0x733   :  { %v247_v7 = vadd.f32 %v245_v6, %v92_v61 }
 0x735   :  { %601 = vtanh.f32 %v247_v7 }
 0x73b   :  { %v602_v8 = vpop.eup %601 }
 0x73c   :  { %v249_v9 = vsub.f32 %v211_v54, %v602_v8 }
 0x73e   :  { %251 = vrot.lane.b32.xlu1 %v249_v9, %s627_s27 }
 0x7b0   :  { %v252_v10 = vpop.permute.xlu1 %251 }
 0x7b1   :  { %v254_v11 = vmul.f32 %v252_v10, %v236_v3 }
 0x7b3   :  { %256 = vrot.lane.b32.xlu2 %v254_v11, %s626_s26 }
 0x80d   :  { %v257_v12 = vpop.permute.xlu2 %256 }
 0x80e   :  { %v259_v14 = vadd.f32 %v602_v8, %v257_v12 }
 0x810   :  { %v260_v15 = vpack.c.bf16 %v259_v14, %v259_v14 }
 0x812   :  { %262 = vrot.lane.b32.xlu0 %v260_v15, %s624_s25 }
 0x884   :  { %v263_v16 = vpop.permute.xlu0 %262 }
 0x885   :  { %573 = vmatmul.msk.bf16.vlgmr.msrb.gmra.mxu1 %vm115_vm2, %v263_v16 }
 0x902   :  { %v276_v17 = vpop.f32.mrf.mxu1 }
 0x903   :  { %v285_v18 = vadd.f32 %v276_v17, %v683_v13  ;;  %v280_v21 = vadd.f32 %v276_v17, %v94_v20 }
 0x905   :  { %287 = vrot.lane.b32.xlu1 %v285_v18, %s624_s25  ;;  %v281_v22 = vmul.f32 0.5, %v280_v21  ;;  %v583_v18 = vld [vmem:[%s766_s0 + $0x18] sm:$0xff]  ;;  %s628_s0 = smov 80  }
 0x906   :  { %565 = vmatmul.msk.bf16.gmra.mxu0 %vm58_vm3, %v583_v18 }
 0x907   :  { %603 = vtanh.f32 %v281_v22 }
 0x90a   :  { %v278_v19 = vpop.f32.mrf.mxu1 }
 0x90d   :  { %v604_v23 = vpop.eup %603 }
 0x90e   :  { %v283_v24 = vadd.f32 1.0, %v604_v23 }
 0x910   :  { %v284_v25 = vmul.f32 0.5, %v283_v24 }
 0x977   :  { %v288_v26 = vpop.permute.xlu1 %287 }
 0x978   :  { %v290_v27 = vmul.f32 %v288_v26, %v284_v25 }
 0x97a   :  { %292 = vrot.lane.b32.xlu2 %v290_v27, %s625_s3 }
 0x983   :  { %v102_v23 = vpop.f32.mrf.mxu0 }
 0x9d4   :  { %v293_v28 = vpop.permute.xlu2 %292 }
 0x9d5   :  { %v295_v29 = vadd.f32 %v293_v28, %v94_v20 }
 0x9d7   :  { %605 = vtanh.f32 %v295_v29 }
 0x9dd   :  { %v606_v30 = vpop.eup %605 }
 0x9de   :  { %v297_v31 = vsub.f32 %v259_v14, %v606_v30 }
 0x9e0   :  { %299 = vrot.lane.b32.xlu0 %v297_v31, %s627_s27 }
 0xa52   :  { %v300_v32 = vpop.permute.xlu0 %299 }
 0xa53   :  { %v302_v33 = vmul.f32 %v300_v32, %v284_v25 }
 0xa55   :  { %304 = vrot.lane.b32.xlu1 %v302_v33, %s626_s26 }
 0xac7   :  { %v305_v34 = vpop.permute.xlu1 %304 }
 0xac8   :  { %v307_v35 = vadd.f32 %v606_v30, %v305_v34 }
 0xaca   :  { %v308_v36 = vpack.c.bf16 %v307_v35, %v307_v35 }
 0xacc   :  { %310 = vrot.lane.b32.xlu2 %v308_v36, %s624_s25 }
 0xb26   :  { %v311_v38 = vpop.permute.xlu2 %310 }
 0xb27   :  { %574 = vmatmul.msk.bf16.vlgmr.msrb.gmra.mxu2 %vm115_vm2, %v311_v38 }
 0xbaa   :  { %v324_v39 = vpop.f32.mrf.mxu2 }
 0xbab   :  { %v333_v40 = vadd.f32 %v324_v39, %v683_v13  ;;  %v328_v43 = vadd.f32 %v324_v39, %v97_v42 }
 0xbad   :  { %335 = vrot.lane.b32.xlu0 %v333_v40, %s624_s25  ;;  %v329_v44 = vmul.f32 0.5, %v328_v43 }
 0xbaf   :  { %607 = vtanh.f32 %v329_v44  ;;  %v104_v44 = vpop.f32.mrf.mxu0 }
 0xbb2   :  { %v326_v41 = vpop.f32.mrf.mxu2 }
 0xbb5   :  { %v608_v45 = vpop.eup %607 }
 0xbb6   :  { %v331_v46 = vadd.f32 1.0, %v608_v45 }
 0xbb8   :  { %v332_v47 = vmul.f32 0.5, %v331_v46 }
 0xc1f   :  { %v336_v48 = vpop.permute.xlu0 %335 }
 0xc20   :  { %v338_v49 = vmul.f32 %v336_v48, %v332_v47 }
 0xc22   :  { %340 = vrot.lane.b32.xlu1 %v338_v49, %s625_s3 }
 0xc94   :  { %v341_v50 = vpop.permute.xlu1 %340 }
 0xc95   :  { %v343_v51 = vadd.f32 %v341_v50, %v97_v42 }
 0xc97   :  { %609 = vtanh.f32 %v343_v51 }
 0xc9d   :  { %v610_v52 = vpop.eup %609 }
 0xc9e   :  { %v345_v53 = vsub.f32 %v307_v35, %v610_v52 }
 0xca0   :  { %347 = vrot.lane.b32.xlu2 %v345_v53, %s627_s27 }
 0xcfa   :  { %v348_v54 = vpop.permute.xlu2 %347 }
 0xcfb   :  { %v350_v55 = vmul.f32 %v348_v54, %v332_v47 }
 0xcfd   :  { %352 = vrot.lane.b32.xlu0 %v350_v55, %s626_s26 }
 0xd6f   :  { %v353_v56 = vpop.permute.xlu0 %352 }
 0xd70   :  { %v355_v57 = vadd.f32 %v610_v52, %v353_v56 }
 0xd72   :  { %v356_v58 = vpack.c.bf16 %v355_v57, %v355_v57 }
 0xd74   :  { %358 = vrot.lane.b32.xlu1 %v356_v58, %s624_s25 }
 0xde6   :  { %v359_v59 = vpop.permute.xlu1 %358 }
 0xde7   :  { %575 = vmatmul.msk.bf16.vlgmr.msrb.gmra.mxu3 %vm115_vm2, %v359_v59 }
 0xe6a   :  { %v372_v60 = vpop.f32.mrf.mxu3 }
 0xe6b   :  { %v381_v61 = vadd.f32 %v372_v60, %v683_v13  ;;  %v376_v1 = vadd.f32 %v372_v60, %v99_v63 }
 0xe6d   :  { %383 = vrot.lane.b32.xlu2 %v381_v61, %s624_s25  ;;  %v377_v2 = vmul.f32 0.5, %v376_v1 }
 0xe6f   :  { %611 = vtanh.f32 %v377_v2 }
 0xe72   :  { %v374_v62 = vpop.f32.mrf.mxu3 }
 0xe75   :  { %v612_v3 = vpop.eup %611 }
 0xe76   :  { %v379_v4 = vadd.f32 1.0, %v612_v3 }
 0xe78   :  { %v380_v5 = vmul.f32 0.5, %v379_v4 }
 0xec7   :  { %v384_v6 = vpop.permute.xlu2 %383 }
 0xec8   :  { %v386_v7 = vmul.f32 %v384_v6, %v380_v5 }
 0xeca   :  { %388 = vrot.lane.b32.xlu0 %v386_v7, %s625_s3 }
 0xf3c   :  { %v389_v8 = vpop.permute.xlu0 %388 }
 0xf3d   :  { %v391_v9 = vadd.f32 %v389_v8, %v99_v63 }
 0xf3f   :  { %613 = vtanh.f32 %v391_v9 }
 0xf45   :  { %v614_v10 = vpop.eup %613 }
 0xf46   :  { %v393_v11 = vsub.f32 %v355_v57, %v614_v10 }
 0xf48   :  { %395 = vrot.lane.b32.xlu1 %v393_v11, %s627_s27 }
 0xfba   :  { %v396_v12 = vpop.permute.xlu1 %395 }
 0xfbb   :  { %v398_v14 = vmul.f32 %v396_v12, %v380_v5 }
 0xfbd   :  { %400 = vrot.lane.b32.xlu2 %v398_v14, %s626_s26 }
0x1017   :  { %v401_v15 = vpop.permute.xlu2 %400 }
0x1018   :  { %v403_v16 = vadd.f32 %v614_v10, %v401_v15 }
0x101a   :  { %v404_v17 = vpack.c.bf16 %v403_v16, %v403_v16 }
0x101c   :  { %406 = vrot.lane.b32.xlu0 %v404_v17, %s624_s25 }
0x108e   :  { %v407_v19 = vpop.permute.xlu0 %406 }
0x108f   :  { %576 = vmatmul.msk.bf16.vlgmr.msra.gmra.mxu1 %vm115_vm2, %v407_v19 }
0x110c   :  { %v420_v20 = vpop.f32.mrf.mxu1 }
0x110d   :  { %v429_v21 = vadd.f32 %v420_v20, %v683_v13  ;;  %v424_v24 = vadd.f32 %v420_v20, %v102_v23 }
0x110f   :  { %431 = vrot.lane.b32.xlu1 %v429_v21, %s624_s25  ;;  %v425_v25 = vmul.f32 0.5, %v424_v24 }
0x1111   :  { %615 = vtanh.f32 %v425_v25 }
0x1114   :  { %v422_v22 = vpop.f32.mrf.mxu1 }
0x1117   :  { %v616_v26 = vpop.eup %615 }
0x1118   :  { %v427_v27 = vadd.f32 1.0, %v616_v26 }
0x111a   :  { %v428_v28 = vmul.f32 0.5, %v427_v27 }
0x1181   :  { %v432_v29 = vpop.permute.xlu1 %431 }
0x1182   :  { %v434_v30 = vmul.f32 %v432_v29, %v428_v28 }
0x1184   :  { %436 = vrot.lane.b32.xlu2 %v434_v30, %s625_s3 }
0x11de   :  { %v437_v31 = vpop.permute.xlu2 %436 }
0x11df   :  { %v439_v32 = vadd.f32 %v437_v31, %v102_v23 }
0x11e1   :  { %617 = vtanh.f32 %v439_v32 }
0x11e7   :  { %v618_v33 = vpop.eup %617 }
0x11e8   :  { %v441_v34 = vsub.f32 %v403_v16, %v618_v33 }
0x11ea   :  { %443 = vrot.lane.b32.xlu0 %v441_v34, %s627_s27 }
0x125c   :  { %v444_v35 = vpop.permute.xlu0 %443 }
0x125d   :  { %v446_v36 = vmul.f32 %v444_v35, %v428_v28 }
0x125f   :  { %448 = vrot.lane.b32.xlu1 %v446_v36, %s626_s26 }
0x12d1   :  { %v449_v37 = vpop.permute.xlu1 %448 }
0x12d2   :  { %v451_v38 = vadd.f32 %v618_v33, %v449_v37 }
0x12d4   :  { %v452_v39 = vpack.c.bf16 %v451_v38, %v451_v38 }
0x12d6   :  { %454 = vrot.lane.b32.xlu2 %v452_v39, %s624_s25 }
0x1330   :  { %v455_v40 = vpop.permute.xlu2 %454 }
0x1331   :  { %577 = vmatmul.msk.bf16.vlgmr.msra.gmra.mxu2 %vm115_vm2, %v455_v40 }
0x13b4   :  { %v468_v41 = vpop.f32.mrf.mxu2 }
0x13b5   :  { %v477_v42 = vadd.f32 %v468_v41, %v683_v13  ;;  %v472_v45 = vadd.f32 %v468_v41, %v104_v44 }
0x13b7   :  { %479 = vrot.lane.b32.xlu0 %v477_v42, %s624_s25  ;;  %v473_v46 = vmul.f32 0.5, %v472_v45 }
0x13b9   :  { %619 = vtanh.f32 %v473_v46 }
0x13bc   :  { %v470_v43 = vpop.f32.mrf.mxu2 }
0x13bf   :  { %v620_v47 = vpop.eup %619 }
0x13c0   :  { %v475_v48 = vadd.f32 1.0, %v620_v47 }
0x13c2   :  { %v476_v49 = vmul.f32 0.5, %v475_v48 }
0x1429   :  { %v480_v50 = vpop.permute.xlu0 %479 }
0x142a   :  { %v482_v51 = vmul.f32 %v480_v50, %v476_v49 }
0x142c   :  { %484 = vrot.lane.b32.xlu1 %v482_v51, %s625_s3 }
0x1434   :  { %504 = vrot.lane.b32.xlu1 %v657_v0, %s628_s0 }
0x149e   :  { %v485_v52 = vpop.permute.xlu1 %484 }
0x149f   :  { %v487_v53 = vadd.f32 %v485_v52, %v104_v44 }
0x14a1   :  { %621 = vtanh.f32 %v487_v53 }
0x14a6   :  { %v505_v58 = vpop.permute.xlu1 %504 }
0x14a7   :  { %v622_v54 = vpop.eup %621  ;;  %521 = vmatpush.bf16.msra.mxu3 %v505_v58 }
0x14a8   :  { %v489_v55 = vsub.f32 %v451_v38, %v622_v54 }
0x14aa   :  { %491 = vrot.lane.b32.xlu2 %v489_v55, %s627_s27 }
0x1504   :  { %v492_v56 = vpop.permute.xlu2 %491 }
0x1505   :  { %v494_v57 = vmul.f32 %v492_v56, %v476_v49 }
0x1507   :  { %496 = vrot.lane.b32.xlu0 %v494_v57, %s626_s26 }
0x150f   :  { %508 = vrot.lane.b32.xlu0 %v683_v13, %s628_s0 }
0x1579   :  { %v497_v59 = vpop.permute.xlu0 %496 }
0x157a   :  { %v499_v60 = vadd.f32 %v622_v54, %v497_v59 }
0x157c   :  { %v500_v61 = vpack.c.bf16 %v499_v60, %v499_v60  ;;  %528 = vrot.lane.b32.xlu1 %v499_v60, %s624_s25 }
0x157e   :  { %502 = vrot.lane.b32.xlu2 %v500_v61, %s624_s25 }
0x1581   :  { %v509_v62 = vpop.permute.xlu0 %508 }
0x15d8   :  { %v503_v0 = vpop.permute.xlu2 %502 }
0x15d9   :  { %578 = vmatmul.msk.bf16.vlgmr.msra.gmra.mxu3 %vm115_vm2, %v503_v0 }
0x15ee   :  { %v529_v13 = vpop.permute.xlu1 %528 }
0x165c   :  { %v523_v63 = vpop.f32.mrf.mxu3 }
0x165d   :  { %v524_v1 = vadd.f32 %v523_v63, %v509_v62 }
0x165f   :  { %532 = vrot.lane.b32.xlu2 %v524_v1, %s626_s26 }
0x1664   :  { %v525_v2 = vpop.f32.mrf.mxu3 }
0x16b9   :  { %v533_v3 = vpop.permute.xlu2 %532 }
0x16ba   :  { %v535_v4 = vsel %vm115_vm2, %v529_v13, %v533_v3 }
0x16bb   :  { %537 = vst.msk [vmem:[%s767_s4] sm:$0xff] %vm536_vm4, %v535_v4 }

</bundles_post_ra>
